<compile_context>
chip_gen: v7x
topology: tpu7x:2x2x1
jax: 0.10.0
libtpu: 0.0.40
codegen_flags: <defaults>
</compile_context>

<pallas_src>
import functools

import jax
import jax.numpy as jnp
import numpy as np
from jax.experimental import pallas as pl
from jax.experimental.pallas import tpu as pltpu


def _cbn_kernel(x_ref, gamma_ref, beta_ref, o_ref, *, eps, count, cb):
    """Fused conditional batch-norm for one channel block.

    x_ref     : (N, Cb, HWp)  activations (VMEM), spatial on the lane axis
    gamma_ref : (N, Cp, 1)    full per-sample scale table  (VMEM-resident)
    beta_ref  : (N, Cp, 1)    full per-sample shift table  (VMEM-resident)
    o_ref     : (N, Cb, HWp)  output                       (VMEM)
    """
    c0 = pl.multiple_of(pl.program_id(0) * cb, cb)

    x = x_ref[...].astype(jnp.float32)                       # (N, Cb, HWp)

    # One-pass statistics.  Sum over N first (pure VPU adds), then a single
    # cross-lane (XLU) reduce over the spatial axis.
    sum_n = jnp.sum(x, axis=0)                               # (Cb, HWp)
    sumsq_n = jnp.sum(x * x, axis=0)                         # (Cb, HWp)
    s1 = jnp.sum(sum_n, axis=-1, keepdims=True)              # (Cb, 1)
    s2 = jnp.sum(sumsq_n, axis=-1, keepdims=True)            # (Cb, 1)

    inv_count = 1.0 / count
    mean = s1 * inv_count                                    # (Cb, 1)
    var = jnp.maximum(s2 * inv_count - mean * mean, 0.0)     # (Cb, 1)
    inv_std = jax.lax.rsqrt(var + eps)                       # (Cb, 1)

    # Per-sample, per-channel affine for this channel window.
    gamma = gamma_ref[:, pl.ds(c0, cb), :].astype(jnp.float32)   # (N, Cb, 1)
    beta = beta_ref[:, pl.ds(c0, cb), :].astype(jnp.float32)     # (N, Cb, 1)

    scale = gamma * inv_std[None]                            # (N, Cb, 1)
    shift = beta - mean[None] * scale                        # (N, Cb, 1)

    # out = x * scale + shift  (single mul+add per element, cast only at store)
    o_ref[...] = (x * scale + shift).astype(o_ref.dtype)


def _pick_channel_block(Cp, N, HWp, itemsize, *, step, target_steps=4,
                        block_budget_bytes=2 << 20, min_block_bytes=1 << 20):
    """Channel tile: divisor of Cp stepped by the sublane-pack factor, sized to
    fit a ~2 MiB streaming budget, preferring >= target_steps grid steps
    (>= 2 per TensorCore on megacore parts) while keeping blocks >= ~1 MiB."""
    divisors = [c for c in range(step, Cp + 1, step) if Cp % c == 0]

    def native_bytes(c):
        return N * c * HWp * itemsize

    fitting = [c for c in divisors if native_bytes(c) <= block_budget_bytes]
    if not fitting:
        # TODO(synk): for huge N*H*W even a single-pack-step channel block can
        # exceed VMEM; a two-pass accumulator over HW chunks would be needed.
        return divisors[0]

    preferred = [c for c in fitting
                 if Cp // c >= target_steps and native_bytes(c) >= min_block_bytes]
    if preferred:
        return max(preferred)
    multi = [c for c in fitting if Cp // c >= 2]
    return max(multi) if multi else max(fitting)


def _vmem_limit_bytes(N, cb, HWp, Cp, itemsize):
    """Double-buffered in+out blocks + in-kernel f32 working copies + gamma/beta
    tables + slack, capped at 32 MiB (safe headroom on v7x's 64 MiB VMEM)."""
    blk_native = N * cb * HWp * itemsize
    blk_f32 = N * cb * HWp * 4
    tables = 2 * N * Cp * 4
    est = 4 * blk_native + 2 * blk_f32 + 4 * tables + (1 << 20)
    return int(min(max(est, 16 << 20), 32 << 20))


def conditional_batch_norm_2d(x_nchw, y, embed_weight, *, eps=1e-5, donate_x=False):
    """Forward pass of ConditionalBatchNorm2d.

    x_nchw       : (N, C, H, W) activations (PyTorch layout)
    y            : (N,) int32 class ids
    embed_weight : (num_classes, 2*C) embedding table ([:, :C] = gamma, [:, C:] = beta)
    """
    N, C, H, W = x_nchw.shape
    HW = H * W
    dtype = x_nchw.dtype
    itemsize = jnp.dtype(dtype).itemsize

    # Sublane-pack step: 8 for f32, 16 for bf16, 32 for int8/fp8.
    step = 8 * max(1, 4 // itemsize)

    # Tiny O(N*C) embedding lookup, hoisted out of the hot path.
    gb = jnp.take(embed_weight, y, axis=0).astype(jnp.float32)   # (N, 2C)
    gamma = gb[:, :C]
    beta = gb[:, C:]

    # Pad channels to the pack step and spatial to a multiple of 128 lanes so
    # stores are unmasked full-width.  Zero padding is exact: stats divide by
    # the TRUE count and padded outputs are sliced away.
    Cp = ((C + step - 1) // step) * step
    HWp = ((HW + 127) // 128) * 128

    # Free reshape (spatial already contiguous): lane-dense (N, C, H*W).
    x = x_nchw.reshape(N, C, HW)
    if Cp != C or HWp != HW:
        x = jnp.pad(x, ((0, 0), (0, Cp - C), (0, HWp - HW)))
    if Cp != C:
        gamma = jnp.pad(gamma, ((0, 0), (0, Cp - C)))
        beta = jnp.pad(beta, ((0, 0), (0, Cp - C)))
    gamma = gamma.reshape(N, Cp, 1)
    beta = beta.reshape(N, Cp, 1)

    cb = _pick_channel_block(Cp, N, HWp, itemsize, step=step)
    grid = (Cp // cb,)

    kernel = functools.partial(_cbn_kernel, eps=float(eps),
                               count=float(N * HW), cb=cb)

    out = pl.pallas_call(
        kernel,
        out_shape=jax.ShapeDtypeStruct((N, Cp, HWp), dtype),
        grid=grid,
        in_specs=[
            pl.BlockSpec((N, cb, HWp), lambda c: (0, c, 0)),
            # Full gamma/beta tables with a constant index_map: DMA'd once,
            # stay VMEM-resident; kernel slices its channel window in-place.
            pl.BlockSpec((N, Cp, 1), lambda c: (0, 0, 0)),
            pl.BlockSpec((N, Cp, 1), lambda c: (0, 0, 0)),
        ],
        out_specs=pl.BlockSpec((N, cb, HWp), lambda c: (0, c, 0)),
        compiler_params=pltpu.CompilerParams(
            dimension_semantics=("parallel",),
            vmem_limit_bytes=_vmem_limit_bytes(N, cb, HWp, Cp, itemsize),
        ),
        cost_estimate=pl.CostEstimate(
            flops=int(6 * N * Cp * HWp),
            transcendentals=int(Cp),
            bytes_accessed=int(2 * N * Cp * HWp * itemsize + 2 * N * Cp * 4),
        ),
        input_output_aliases={0: 0} if donate_x else {},
    )(x, gamma, beta)

    if Cp != C or HWp != HW:
        out = out[:, :C, :HW]
    return out.reshape(N, C, H, W)


def init_cbn_params(key, num_features, num_classes):
    """Embedding init matching the PyTorch module: gamma ~ N(1, 0.02), beta = 0."""
    gamma_w = 1.0 + 0.02 * jax.random.normal(
        key, (num_classes, num_features), jnp.float32
    )
    beta_w = jnp.zeros((num_classes, num_features), jnp.float32)
    return jnp.concatenate([gamma_w, beta_w], axis=1)  # (num_classes, 2*C)


# ---------- pure-JAX reference (for correctness check only) ----------
def _ref_cbn(x_nchw, y, embed_weight, eps=1e-5):
    N, C, H, W = x_nchw.shape
    mean = jnp.mean(x_nchw, axis=(0, 2, 3), keepdims=True)
    var = jnp.mean((x_nchw - mean) ** 2, axis=(0, 2, 3), keepdims=True)
    xhat = (x_nchw - mean) / jnp.sqrt(var + eps)
    gb = embed_weight[y]                                    # (N, 2C)
    gamma = gb[:, :C].reshape(N, C, 1, 1)
    beta = gb[:, C:].reshape(N, C, 1, 1)
    return gamma * xhat + beta


if __name__ == "__main__":
    # Small shapes consistent with the module: batch=2, num_features=4, 16x16.
    N, C, H, W = 2, 4, 16, 16
    NUM_CLASSES = 10

    key = jax.random.PRNGKey(0)
    kx, ky, ke = jax.random.split(key, 3)
    x = jax.random.normal(kx, (N, C, H, W), dtype=jnp.float32)
    y = jax.random.randint(ky, (N,), 0, NUM_CLASSES, dtype=jnp.int32)
    embed_w = init_cbn_params(ke, C, NUM_CLASSES)

    out = conditional_batch_norm_2d(x, y, embed_w)
    out = jax.block_until_ready(out)
    assert out.shape == (N, C, H, W), out.shape

    ref = jax.block_until_ready(_ref_cbn(x, y, embed_w))
    np.testing.assert_allclose(np.asarray(out), np.asarray(ref), rtol=1e-4, atol=1e-4)

    print("KERNEL_OK")
</pallas_src>

<mosaic_0001>
module attributes {stable_mosaic.version = 11 : i64} {
  func.func @_cbn_kernel(%arg0: i32, %arg1: memref<2x8x256xf32, #tpu.memory_space<vmem>>, %arg2: memref<2x8x1xf32, #tpu.memory_space<vmem>>, %arg3: memref<2x8x1xf32, #tpu.memory_space<vmem>>, %arg4: memref<2x8x256xf32, #tpu.memory_space<vmem>>) attributes {dimension_semantics = [#tpu.dimension_semantics<parallel>], iteration_bounds = array<i64: 1>, scalar_prefetch = 0 : i64, scratch_operands = 0 : i64, tpu.core_type = #tpu.core_type<tc>, window_params = [{transform_indices = @transform_0, window_bounds = array<i64: 2, 8, 256>}, {pipeline_mode = #tpu.pipeline_mode<synchronous>, transform_indices = @transform_1, window_bounds = array<i64: 2, 8, 1>}, {pipeline_mode = #tpu.pipeline_mode<synchronous>, transform_indices = @transform_2, window_bounds = array<i64: 2, 8, 1>}, {transform_indices = @transform_3, window_bounds = array<i64: 2, 8, 256>}]} {
    %c8_i32 = arith.constant 8 : i32
    %0 = arith.muli %arg0, %c8_i32 : i32
    %1 = tpu.assume_multiple %0, 8 : i32
    %c0 = arith.constant 0 : index
    %c0_0 = arith.constant 0 : index
    %c0_1 = arith.constant 0 : index
    %2 = vector.load %arg1[%c0, %c0_0, %c0_1] : memref<2x8x256xf32, #tpu.memory_space<vmem>>, vector<2x8x256xf32>
    %cst = arith.constant dense<0.000000e+00> : vector<8x256xf32>
    %3 = vector.multi_reduction <add>, %2, %cst [0] : vector<2x8x256xf32> to vector<8x256xf32>
    %4 = arith.mulf %2, %2 : vector<2x8x256xf32>
    %cst_2 = arith.constant dense<0.000000e+00> : vector<8x256xf32>
    %5 = vector.multi_reduction <add>, %4, %cst_2 [0] : vector<2x8x256xf32> to vector<8x256xf32>
    %cst_3 = arith.constant dense<0.000000e+00> : vector<8xf32>
    %6 = vector.multi_reduction <add>, %3, %cst_3 [1] : vector<8x256xf32> to vector<8xf32>
    %7 = vector.shape_cast %6 : vector<8xf32> to vector<8x1xf32>
    %cst_4 = arith.constant dense<0.000000e+00> : vector<8xf32>
    %8 = vector.multi_reduction <add>, %5, %cst_4 [1] : vector<8x256xf32> to vector<8xf32>
    %9 = vector.shape_cast %8 : vector<8xf32> to vector<8x1xf32>
    %cst_5 = arith.constant 0.001953125 : f32
    %10 = vector.broadcast %cst_5 : f32 to vector<8x1xf32>
    %11 = arith.mulf %7, %10 : vector<8x1xf32>
    %cst_6 = arith.constant 0.001953125 : f32
    %12 = vector.broadcast %cst_6 : f32 to vector<8x1xf32>
    %13 = arith.mulf %9, %12 : vector<8x1xf32>
    %14 = arith.mulf %11, %11 : vector<8x1xf32>
    %15 = arith.subf %13, %14 : vector<8x1xf32>
    %cst_7 = arith.constant 0.000000e+00 : f32
    %16 = vector.broadcast %cst_7 : f32 to vector<8x1xf32>
    %17 = arith.maximumf %15, %16 : vector<8x1xf32>
    %cst_8 = arith.constant 9.99999974E-6 : f32
    %18 = vector.broadcast %cst_8 : f32 to vector<8x1xf32>
    %19 = arith.addf %17, %18 : vector<8x1xf32>
    %20 = math.rsqrt %19 : vector<8x1xf32>
    %c0_9 = arith.constant 0 : index
    %21 = arith.index_cast %1 : i32 to index
    %c0_10 = arith.constant 0 : index
    %22 = vector.load %arg2[%c0_9, %21, %c0_10] : memref<2x8x1xf32, #tpu.memory_space<vmem>>, vector<2x8x1xf32>
    %c0_11 = arith.constant 0 : index
    %23 = arith.index_cast %1 : i32 to index
    %c0_12 = arith.constant 0 : index
    %24 = vector.load %arg3[%c0_11, %23, %c0_12] : memref<2x8x1xf32, #tpu.memory_space<vmem>>, vector<2x8x1xf32>
    %25 = vector.shape_cast %20 : vector<8x1xf32> to vector<1x8x1xf32>
    %26 = vector.broadcast %25 : vector<1x8x1xf32> to vector<2x8x1xf32>
    %27 = arith.mulf %22, %26 : vector<2x8x1xf32>
    %28 = vector.shape_cast %11 : vector<8x1xf32> to vector<1x8x1xf32>
    %29 = vector.broadcast %28 : vector<1x8x1xf32> to vector<2x8x1xf32>
    %30 = arith.mulf %29, %27 : vector<2x8x1xf32>
    %31 = arith.subf %24, %30 : vector<2x8x1xf32>
    %32 = vector.broadcast %27 : vector<2x8x1xf32> to vector<2x8x256xf32>
    %33 = arith.mulf %2, %32 : vector<2x8x256xf32>
    %34 = vector.broadcast %31 : vector<2x8x1xf32> to vector<2x8x256xf32>
    %35 = arith.addf %33, %34 : vector<2x8x256xf32>
    %c0_13 = arith.constant 0 : index
    %c0_14 = arith.constant 0 : index
    %c0_15 = arith.constant 0 : index
    %36 = vector.load %arg4[%c0_13, %c0_14, %c0_15] : memref<2x8x256xf32, #tpu.memory_space<vmem>>, vector<2x8x256xf32>
    tpu.vector_store %arg4[%c0_13, %c0_14, %c0_15], %35 {strides = array<i32>} : memref<2x8x256xf32, #tpu.memory_space<vmem>>, vector<2x8x256xf32>,
    return
  }
  func.func @transform_0(%arg0: i32) -> (i32, i32, i32) {
    %c0_i32 = arith.constant 0 : i32
    %c0_i32_0 = arith.constant 0 : i32
    %c0_i32_1 = arith.constant 0 : i32
    return %c0_i32, %arg0, %c0_i32_0 : i32, i32, i32
  }
  func.func @transform_1(%arg0: i32) -> (i32, i32, i32) {
    %c0_i32 = arith.constant 0 : i32
    %c0_i32_0 = arith.constant 0 : i32
    %c0_i32_1 = arith.constant 0 : i32
    %c0_i32_2 = arith.constant 0 : i32
    return %c0_i32, %c0_i32_0, %c0_i32_1 : i32, i32, i32
  }
  func.func @transform_2(%arg0: i32) -> (i32, i32, i32) {
    %c0_i32 = arith.constant 0 : i32
    %c0_i32_0 = arith.constant 0 : i32
    %c0_i32_1 = arith.constant 0 : i32
    %c0_i32_2 = arith.constant 0 : i32
    return %c0_i32, %c0_i32_0, %c0_i32_1 : i32, i32, i32
  }
  func.func @transform_3(%arg0: i32) -> (i32, i32, i32) {
    %c0_i32 = arith.constant 0 : i32
    %c0_i32_0 = arith.constant 0 : i32
    %c0_i32_1 = arith.constant 0 : i32
    return %c0_i32, %arg0, %c0_i32_0 : i32, i32, i32
  }
}

</mosaic_0001>

<bundles_post_ra>
// kernel: tpu_custom_call.1
= control target key start
LH: loop header
LB: loop body
LE: loop exit
PB: predicated region body
PF: predicated region fallthrough
CT: control target
= control target key end

     0   :  { %s193_s0 = inlined_call_operand.vmem [shape: f32[2,8,256], index: 0, kind: input, shape index: {}]   ;;  %s194_s1 = inlined_call_operand.vmem [shape: f32[2,8,1], index: 1, kind: input, shape index: {}]   ;;  %s195_s2 = inlined_call_operand.vmem [shape: f32[2,8,1], index: 2, kind: input, shape index: {}]   ;;  %s196_s3 = inlined_call_operand.hbm [shape: f32[2,8,256], index: 3, kind: output, shape index: {}]  }
   0x1   :  { %v16_v0 = vld [vmem:[%s193_s0] sm:$0xff]  ;;  %v17_v1 = vld [vmem:[%s193_s0 + $0x8] sm:$0xff]  ;;  %v18_v2 = vld [vmem:[%s193_s0 + $0x10] sm:$0xff] }
   0x2   :  { %v19_v3 = vld [vmem:[%s193_s0 + $0x18] sm:$0xff]  ;;  %v20_v4 = vadd.f32 %v18_v2, %v16_v0  ;;  %v22_v5 = vmul.f32 %v16_v0, %v16_v0  ;;  %v23_v6 = vmul.f32 %v17_v1, %v17_v1  ;;  %v24_v7 = vmul.f32 %v18_v2, %v18_v2 }
   0x3   :  { %8 = vsyncpa [#allocation3], 0  ;;  %v21_v8 = vadd.f32 %v19_v3, %v17_v1  ;;  %v25_v9 = vmul.f32 %v19_v3, %v19_v3  ;;  %v133_v14 = vmov 0   ;;  %v42_v23 = vld [vmem:[%s194_s1] sm:$0xff]  ;;  %v43_v24 = vld [vmem:[%s194_s1 + $0x8] sm:$0xff]  ;;  %s134_s1 = smov [#allocation2]  }
   0x4   :  { %v26_v10 = vadd.f32 %v24_v7, %v22_v5  ;;  %105 = vset.pattern.permute.xlu1 %v133_v14  ;;  %106 = vset.pattern.permute.xlu0 %v133_v14  ;;  %v45_v28 = vld [vmem:[%s195_s2] sm:$0xff]  ;;  %v46_v32 = vld [vmem:[%s195_s2 + $0x8] sm:$0xff]  ;;  %s90_s27 = sshll.u32 %s134_s1, 4  ;;  %s91_s27 = int_to_ptr.vmem [resolvable:$true] %s90_s27 }
   0x5   :  { %v28_v11 = vadd.f32 %v21_v8, %v20_v4  ;;  %v27_v12 = vadd.f32 %v25_v9, %v23_v6  ;;  %s109_s2 = scalar_lea.vmem %s91_s27, 512  ;;  %p114_p1 = scmp.lt.s32.totalorder %s91_s27, %s91_s27 }
   0x6   :  { %p110_p0 = scmp.ne.s32.totalorder %s91_s27, %s109_s2  ;;  %p115_p2 = scmp.lt.s32.totalorder %s109_s2, %s109_s2 }
   0x7   :  { %29 = vadd.xlane.f32.xlu0 %v28_v11  ;;  %v31_v13 = vadd.f32 %v27_v12, %v26_v10 }
   0x8   :  { %p116_p3 = por %p115_p2, %p114_p1 }
   0xa   :  { %p117_p4 = pnand %p116_p3, %p110_p0 }
   0xb   :  { %32 = vadd.xlane.f32.xlu0 %v31_v13 }
  0x94   :  { %v30_v15 = vpop.xlane.xlu0 %29 }
  0x95   :  { %v34_v16 = vmul.f32 0.001953125, %v30_v15 }
  0x97   :  { %v36_v18 = vmul.f32 %v34_v16, %v34_v16 }
  0x98   :  { %v33_v17 = vpop.xlane.xlu0 %32 }
  0x99   :  { %v35_v19 = vmul.f32 0.001953125, %v33_v17 }
  0x9b   :  { %v37_v20 = vsub.f32 %v35_v19, %v36_v18 }
  0x9d   :  { %v38_v21 = vmax.f32 %v37_v20, 0.0 }
  0x9f   :  { %v39_v22 = vadd.f32 1e-05, %v38_v21 }
  0xa1   :  { %107 = vrsqrt.f32 %v39_v22 }
  0xab   :  { %v108_v25 = vpop.eup %107 }
  0xac   :  { %v47_v26 = vmul.f32 %v108_v25, %v42_v23  ;;  %v48_v27 = vmul.f32 %v108_v25, %v43_v24 }
  0xae   :  { %55 = vperm.xlu1 %105, %v47_v26   ;;  %v49_v29 = vmul.f32 %v47_v26, %v34_v16  ;;  %v50_v31 = vmul.f32 %v48_v27, %v34_v16 }
  0xb0   :  { %v51_v30 = vsub.f32 %v45_v28, %v49_v29  ;;  %v52_v33 = vsub.f32 %v46_v32, %v50_v31 }
  0xb2   :  { %60 = vperm.xlu1 %105, %v48_v27   ;;  %69 = vperm.xlu0 %106, %v51_v30  }
  0xb6   :  { %74 = vperm.xlu1 %105, %v52_v33  }
 0x12d   :  { %v56_v34 = vpop.permute.xlu1 %55 }
 0x12e   :  { %v63_v35 = vmul.f32 %v56_v34, %v16_v0  ;;  %v64_v36 = vmul.f32 %v56_v34, %v17_v1 }
 0x131   :  { %v61_v37 = vpop.permute.xlu1 %60  ;;  %v70_v38 = vpop.permute.xlu0 %69 }
 0x132   :  { %v77_v39 = vadd.f32 %v70_v38, %v63_v35  ;;  %v78_v40 = vadd.f32 %v70_v38, %v64_v36  ;;  %v65_v41 = vmul.f32 %v61_v37, %v18_v2  ;;  %v66_v42 = vmul.f32 %v61_v37, %v19_v3 }
 0x134   :  { %81 = vst [vmem:[#allocation2] sm:$0xff] %v77_v39  ;;  %82 = vst [vmem:[#allocation2 + $0x8] sm:$0xff] %v78_v40 }
 0x135   :  { %v75_v43 = vpop.permute.xlu1 %74 }
 0x136   :  { %v79_v44 = vadd.f32 %v75_v43, %v65_v41  ;;  %v80_v45 = vadd.f32 %v75_v43, %v66_v42 }
 0x138   :  { %83 = vst [vmem:[#allocation2 + $0x10] sm:$0xff] %v79_v44  ;;  %84 = vst [vmem:[#allocation2 + $0x18] sm:$0xff] %v80_v45 }
 0x139   :  { %120 = shalt.err (!%p117_p4)
}
 0x13a   :  { %s121_s30 = scalar_lea.hbm %s196_s3, 512 }
 0x13b   :  { %p122_p5 = scmp.ne.s32.totalorder %s196_s3, %s121_s30  ;;  %p125_p6 = scmp.lt.u32.totalorder %s121_s30, %s196_s3 }
 0x13d   :  { %p127_p7 = pnand %p125_p6, %p122_p5 }
 0x13f   :  { %130 = shalt.err (!%p127_p7)
}
 0x140   :  { %s135_s8 = smov 256   ;;  %s136_s9 = smov 16  }
 0x141   :  { %96 = dma.vmem_to_hbm [thread:$0]  %s91_s27, 512, %s196_s3, [#allocation3], %s135_s8, %s135_s8, %s136_s9  }
 0x142   :  { %131 = dma.done.wait [#allocation3], 512  }
 0x143   :  { %132 = vsyncadd [#allocation3], 4294966784 }
 0x144   :  { %100 = vsyncpa [#allocation3], 1 }

</bundles_post_ra>
